<compile_context>
chip_gen: v7x
topology: tpu7x:2x2x1
jax: 0.10.0
libtpu: 0.0.40
codegen_flags: <defaults>
</compile_context>

<pallas_src>
import functools

import jax
import jax.numpy as jnp
import numpy as np
from jax.experimental import pallas as pl
from jax.experimental.pallas import tpu as pltpu


def _shift_kernel(shift_ref, x_ref, o_ref, xpad_ref, *, pad, nb):
    """One grid step processes `nb` batch samples.

    shift_ref: SMEM int32 (2, n_padded); row 0 = width shift kx, row 1 = height shift ky.
    x_ref / o_ref: VMEM (nb, c, h, w) blocks for the current batch block.
    xpad_ref: VMEM scratch (nb, c, h + 2*pad, w): the H-replicate-padded block.
    """
    blk = pl.program_id(0)
    _, c, h, w = x_ref.shape

    # ---- replicate-pad along H, once for the whole block -------------------
    x_blk = x_ref[...]                                           # (nb, c, h, w)
    xpad_ref[:, :, pad:pad + h, :] = x_blk
    top = jnp.broadcast_to(x_blk[:, :, 0:1, :], (nb, c, pad, w))
    bot = jnp.broadcast_to(x_blk[:, :, h - 1:h, :], (nb, c, pad, w))
    xpad_ref[:, :, 0:pad, :] = top
    xpad_ref[:, :, pad + h:pad + h + pad, :] = bot

    # Hoisted iotas for the per-sample W selection matrix (built once per step).
    src = jax.lax.broadcasted_iota(jnp.int32, (w, w), 0)         # source column x
    dst = jax.lax.broadcasted_iota(jnp.int32, (w, w), 1)         # output column s

    for b in range(nb):                                          # nb is small & static
        g = blk * nb + b
        kx = shift_ref[0, g]          # width shift,  in [0, 2*pad]
        ky = shift_ref[1, g]          # height shift, in [0, 2*pad]

        # H shift: sublane dynamic slice of the replicate-padded-H buffer.
        rows = xpad_ref[b, :, pl.ds(ky, h), :]                   # (c, h, w)

        # W shift + replicate clamp as an exact 0/1 selection matrix (MXU):
        #   out[..., s] = rows[..., clamp(s + kx - pad, 0, w - 1)]
        col = jnp.clip(dst + (kx - pad), 0, w - 1)
        a_col = (src == col).astype(jnp.float32)                 # (w, w)

        out2 = jnp.dot(rows.reshape(c * h, w), a_col,
                       preferred_element_type=jnp.float32)       # (c*h, w) - no transpose
        o_ref[b] = out2.reshape(c, h, w).astype(o_ref.dtype)


def random_shifts_aug(x, shift, pad, *, block_n=8):
    """Pallas implementation of RandomShiftsAug.forward.

    x:     (n, c, h, w) array (any float/int dtype; cast to float32 like x.float()).
    shift: (n, 2) int32 in [0, 2*pad]; column 0 = width shift, column 1 = height shift.
    block_n: batch samples per grid step (size per-chip VMEM: <=8 for 84x84x9 on v5e).
    """
    x = x.astype(jnp.float32)
    n, c, h, w = x.shape
    assert h == w, "RandomShiftsAug requires square images"
    shift = shift.astype(jnp.int32)

    nb = max(1, min(block_n, n))
    n_blocks = pl.cdiv(n, nb)
    n_pad = n_blocks * nb
    if n_pad != n:
        x = jnp.pad(x, ((0, n_pad - n), (0, 0), (0, 0), (0, 0)))
        shift = jnp.pad(shift, ((0, n_pad - n), (0, 0)))

    # SMEM-friendly scalar-prefetch layout: (2, n_pad), long axis last.
    shift_t = jnp.transpose(shift)                               # (2, n_pad)

    kernel = functools.partial(_shift_kernel, pad=pad, nb=nb)

    grid_spec = pltpu.PrefetchScalarGridSpec(
        num_scalar_prefetch=1,
        grid=(n_blocks,),
        in_specs=[pl.BlockSpec((nb, c, h, w), lambda i, s: (i, 0, 0, 0))],
        out_specs=pl.BlockSpec((nb, c, h, w), lambda i, s: (i, 0, 0, 0)),
        scratch_shapes=[pltpu.VMEM((nb, c, h + 2 * pad, w), jnp.float32)],
    )

    out = pl.pallas_call(
        kernel,
        grid_spec=grid_spec,
        out_shape=jax.ShapeDtypeStruct((n_pad, c, h, w), jnp.float32),
        compiler_params=pltpu.CompilerParams(
            dimension_semantics=("parallel",),
            vmem_limit_bytes=64 * 1024 * 1024,
        ),
    )(shift_t, x)

    return out[:n] if n_pad != n else out


if __name__ == "__main__":
    pad = 4
    n, c, h, w = 2, 4, 16, 16

    key = jax.random.PRNGKey(0)
    kx_key, ks_key = jax.random.split(key)
    x = jax.random.normal(kx_key, (n, c, h, w), dtype=jnp.float32)
    # torch.randint(0, 2*pad+1, (n, 1, 1, 2)) equivalent (different RNG stream).
    shift = jax.random.randint(ks_key, (n, 2), 0, 2 * pad + 1, dtype=jnp.int32)

    out = random_shifts_aug(x, shift, pad)
    out = jax.block_until_ready(out)

    # Reference: exact-arithmetic result of the module = shifted crop of the
    # replicate-padded image.
    xp = jnp.pad(x, ((0, 0), (0, 0), (pad, pad), (pad, pad)), mode="edge")
    shift_np = np.asarray(shift)
    ref = jnp.stack([
        jax.lax.dynamic_slice(
            xp[b], (0, int(shift_np[b, 1]), int(shift_np[b, 0])), (c, h, w))
        for b in range(n)
    ])

    assert out.shape == (n, c, h, w) and out.dtype == jnp.float32
    assert np.allclose(np.asarray(out), np.asarray(ref), atol=1e-5), "mismatch vs reference"

    print("KERNEL_OK")
</pallas_src>

<mosaic_0001>
module attributes {stable_mosaic.version = 11 : i64} {
  func.func @_shift_kernel(%arg0: i32, %arg1: memref<2x2xi32, #tpu.memory_space<smem>>, %arg2: memref<2x4x16x16xf32, #tpu.memory_space<vmem>>, %arg3: memref<2x4x16x16xf32, #tpu.memory_space<vmem>>, %arg4: memref<2x4x24x16xf32, #tpu.memory_space<vmem>>) attributes {dimension_semantics = [#tpu.dimension_semantics<parallel>], iteration_bounds = array<i64: 1>, scalar_prefetch = 1 : i64, scratch_operands = 1 : i64, tpu.core_type = #tpu.core_type<tc>, window_params = [{transform_indices = @transform_0, window_bounds = array<i64: 2, 4, 16, 16>}, {transform_indices = @transform_1, window_bounds = array<i64: 2, 4, 16, 16>}]} {
    %c0 = arith.constant 0 : index
    %c0_0 = arith.constant 0 : index
    %c0_1 = arith.constant 0 : index
    %c0_2 = arith.constant 0 : index
    %0 = vector.load %arg2[%c0, %c0_0, %c0_1, %c0_2] : memref<2x4x16x16xf32, #tpu.memory_space<vmem>>, vector<2x4x16x16xf32>
    %c0_3 = arith.constant 0 : index
    %c0_4 = arith.constant 0 : index
    %c4 = arith.constant 4 : index
    %c0_5 = arith.constant 0 : index
    %1 = vector.load %arg4[%c0_3, %c0_4, %c4, %c0_5] : memref<2x4x24x16xf32, #tpu.memory_space<vmem>>, vector<2x4x16x16xf32>
    tpu.vector_store %arg4[%c0_3, %c0_4, %c4, %c0_5], %0 {strides = array<i32>} : memref<2x4x24x16xf32, #tpu.memory_space<vmem>>, vector<2x4x16x16xf32>,
    %2 = vector.extract_strided_slice %0 {offsets = [0, 0, 0, 0], sizes = [2, 4, 1, 16], strides = [1, 1, 1, 1]} : vector<2x4x16x16xf32> to vector<2x4x1x16xf32>
    %3 = vector.shape_cast %2 : vector<2x4x1x16xf32> to vector<2x4x1x16xf32>
    %4 = vector.broadcast %3 : vector<2x4x1x16xf32> to vector<2x4x4x16xf32>
    %5 = vector.extract_strided_slice %0 {offsets = [0, 0, 15, 0], sizes = [2, 4, 1, 16], strides = [1, 1, 1, 1]} : vector<2x4x16x16xf32> to vector<2x4x1x16xf32>
    %6 = vector.shape_cast %5 : vector<2x4x1x16xf32> to vector<2x4x1x16xf32>
    %7 = vector.broadcast %6 : vector<2x4x1x16xf32> to vector<2x4x4x16xf32>
    %c0_6 = arith.constant 0 : index
    %c0_7 = arith.constant 0 : index
    %c0_8 = arith.constant 0 : index
    %c0_9 = arith.constant 0 : index
    %8 = vector.load %arg4[%c0_6, %c0_7, %c0_8, %c0_9] : memref<2x4x24x16xf32, #tpu.memory_space<vmem>>, vector<2x4x4x16xf32>
    tpu.vector_store %arg4[%c0_6, %c0_7, %c0_8, %c0_9], %4 {strides = array<i32>} : memref<2x4x24x16xf32, #tpu.memory_space<vmem>>, vector<2x4x4x16xf32>,
    %c0_10 = arith.constant 0 : index
    %c0_11 = arith.constant 0 : index
    %c20 = arith.constant 20 : index
    %c0_12 = arith.constant 0 : index
    %9 = vector.load %arg4[%c0_10, %c0_11, %c20, %c0_12] : memref<2x4x24x16xf32, #tpu.memory_space<vmem>>, vector<2x4x4x16xf32>
    tpu.vector_store %arg4[%c0_10, %c0_11, %c20, %c0_12], %7 {strides = array<i32>} : memref<2x4x24x16xf32, #tpu.memory_space<vmem>>, vector<2x4x4x16xf32>,
    %10 = tpu.iota {dimensions = array<i32: 0>} : vector<16x16xi32>
    %11 = tpu.iota {dimensions = array<i32: 1>} : vector<16x16xi32>
    %c2_i32 = arith.constant 2 : i32
    %12 = arith.muli %arg0, %c2_i32 : i32
    %c0_i32 = arith.constant 0 : i32
    %13 = arith.addi %12, %c0_i32 : i32
    %c0_13 = arith.constant 0 : index
    %14 = arith.index_cast %13 : i32 to index
    %15 = memref.load %arg1[%c0_13, %14] : memref<2x2xi32, #tpu.memory_space<smem>>
    %c1 = arith.constant 1 : index
    %16 = arith.index_cast %13 : i32 to index
    %17 = memref.load %arg1[%c1, %16] : memref<2x2xi32, #tpu.memory_space<smem>>
    %c0_14 = arith.constant 0 : index
    %c0_15 = arith.constant 0 : index
    %18 = arith.index_cast %17 : i32 to index
    %c0_16 = arith.constant 0 : index
    %19 = vector.load %arg4[%c0_14, %c0_15, %18, %c0_16] : memref<2x4x24x16xf32, #tpu.memory_space<vmem>>, vector<1x4x16x16xf32>
    %20 = vector.shape_cast %19 : vector<1x4x16x16xf32> to vector<4x16x16xf32>
    %c4_i32 = arith.constant 4 : i32
    %21 = arith.subi %15, %c4_i32 : i32
    %22 = vector.broadcast %21 : i32 to vector<16x16xi32>
    %23 = arith.addi %11, %22 : vector<16x16xi32>
    %c0_i32_17 = arith.constant 0 : i32
    %c15_i32 = arith.constant 15 : i32
    %24 = vector.broadcast %c0_i32_17 : i32 to vector<16x16xi32>
    %25 = arith.maxsi %24, %23 : vector<16x16xi32>
    %26 = vector.broadcast %c15_i32 : i32 to vector<16x16xi32>
    %27 = arith.minsi %26, %25 : vector<16x16xi32>
    %28 = arith.cmpi eq, %10, %27 : vector<16x16xi32>
    %29 = arith.extui %28 : vector<16x16xi1> to vector<16x16xi32>
    %30 = arith.sitofp %29 : vector<16x16xi32> to vector<16x16xf32>
    %31 = vector.shape_cast %20 : vector<4x16x16xf32> to vector<64x16xf32>
    %cst = arith.constant dense<0.000000e+00> : vector<64x16xf32>
    %32 = tpu.matmul %31, %30, %cst {dimension_numbers = #tpu.dot_dimension_numbers<[1], [0], [0], [1], [0, 0, 1, 1], [], []>} : vector<64x16xf32>, vector<16x16xf32>, vector<64x16xf32> -> vector<64x16xf32>
    %33 = vector.shape_cast %32 : vector<64x16xf32> to vector<4x16x16xf32>
    %c0_18 = arith.constant 0 : index
    %c0_19 = arith.constant 0 : index
    %c0_20 = arith.constant 0 : index
    %c0_21 = arith.constant 0 : index
    %34 = vector.load %arg3[%c0_18, %c0_19, %c0_20, %c0_21] : memref<2x4x16x16xf32, #tpu.memory_space<vmem>>, vector<1x4x16x16xf32>
    %35 = vector.shape_cast %34 : vector<1x4x16x16xf32> to vector<4x16x16xf32>
    %36 = vector.shape_cast %33 : vector<4x16x16xf32> to vector<1x4x16x16xf32>
    tpu.vector_store %arg3[%c0_18, %c0_19, %c0_20, %c0_21], %36 {strides = array<i32>} : memref<2x4x16x16xf32, #tpu.memory_space<vmem>>, vector<1x4x16x16xf32>,
    %c2_i32_22 = arith.constant 2 : i32
    %37 = arith.muli %arg0, %c2_i32_22 : i32
    %c1_i32 = arith.constant 1 : i32
    %38 = arith.addi %37, %c1_i32 : i32
    %c0_23 = arith.constant 0 : index
    %39 = arith.index_cast %38 : i32 to index
    %40 = memref.load %arg1[%c0_23, %39] : memref<2x2xi32, #tpu.memory_space<smem>>
    %c1_24 = arith.constant 1 : index
    %41 = arith.index_cast %38 : i32 to index
    %42 = memref.load %arg1[%c1_24, %41] : memref<2x2xi32, #tpu.memory_space<smem>>
    %c1_25 = arith.constant 1 : index
    %c0_26 = arith.constant 0 : index
    %43 = arith.index_cast %42 : i32 to index
    %c0_27 = arith.constant 0 : index
    %44 = vector.load %arg4[%c1_25, %c0_26, %43, %c0_27] : memref<2x4x24x16xf32, #tpu.memory_space<vmem>>, vector<1x4x16x16xf32>
    %45 = vector.shape_cast %44 : vector<1x4x16x16xf32> to vector<4x16x16xf32>
    %c4_i32_28 = arith.constant 4 : i32
    %46 = arith.subi %40, %c4_i32_28 : i32
    %47 = vector.broadcast %46 : i32 to vector<16x16xi32>
    %48 = arith.addi %11, %47 : vector<16x16xi32>
    %c0_i32_29 = arith.constant 0 : i32
    %c15_i32_30 = arith.constant 15 : i32
    %49 = vector.broadcast %c0_i32_29 : i32 to vector<16x16xi32>
    %50 = arith.maxsi %49, %48 : vector<16x16xi32>
    %51 = vector.broadcast %c15_i32_30 : i32 to vector<16x16xi32>
    %52 = arith.minsi %51, %50 : vector<16x16xi32>
    %53 = arith.cmpi eq, %10, %52 : vector<16x16xi32>
    %54 = arith.extui %53 : vector<16x16xi1> to vector<16x16xi32>
    %55 = arith.sitofp %54 : vector<16x16xi32> to vector<16x16xf32>
    %56 = vector.shape_cast %45 : vector<4x16x16xf32> to vector<64x16xf32>
    %cst_31 = arith.constant dense<0.000000e+00> : vector<64x16xf32>
    %57 = tpu.matmul %56, %55, %cst_31 {dimension_numbers = #tpu.dot_dimension_numbers<[1], [0], [0], [1], [0, 0, 1, 1], [], []>} : vector<64x16xf32>, vector<16x16xf32>, vector<64x16xf32> -> vector<64x16xf32>
    %58 = vector.shape_cast %57 : vector<64x16xf32> to vector<4x16x16xf32>
    %c1_32 = arith.constant 1 : index
    %c0_33 = arith.constant 0 : index
    %c0_34 = arith.constant 0 : index
    %c0_35 = arith.constant 0 : index
    %59 = vector.load %arg3[%c1_32, %c0_33, %c0_34, %c0_35] : memref<2x4x16x16xf32, #tpu.memory_space<vmem>>, vector<1x4x16x16xf32>
    %60 = vector.shape_cast %59 : vector<1x4x16x16xf32> to vector<4x16x16xf32>
    %61 = vector.shape_cast %58 : vector<4x16x16xf32> to vector<1x4x16x16xf32>
    tpu.vector_store %arg3[%c1_32, %c0_33, %c0_34, %c0_35], %61 {strides = array<i32>} : memref<2x4x16x16xf32, #tpu.memory_space<vmem>>, vector<1x4x16x16xf32>,
    return
  }
  func.func @transform_0(%arg0: i32, %arg1: memref<2x2xi32, #tpu.memory_space<smem>>) -> (i32, i32, i32, i32) {
    %c0_i32 = arith.constant 0 : i32
    %c0_i32_0 = arith.constant 0 : i32
    %c0_i32_1 = arith.constant 0 : i32
    %c0_i32_2 = arith.constant 0 : i32
    return %arg0, %c0_i32, %c0_i32_0, %c0_i32_1 : i32, i32, i32, i32
  }
  func.func @transform_1(%arg0: i32, %arg1: memref<2x2xi32, #tpu.memory_space<smem>>) -> (i32, i32, i32, i32) {
    %c0_i32 = arith.constant 0 : i32
    %c0_i32_0 = arith.constant 0 : i32
    %c0_i32_1 = arith.constant 0 : i32
    %c0_i32_2 = arith.constant 0 : i32
    return %arg0, %c0_i32, %c0_i32_0, %c0_i32_1 : i32, i32, i32, i32
  }
}

</mosaic_0001>

<bundles_post_ra>
// kernel: tpu_custom_call.1
= control target key start
LH: loop header
LB: loop body
LE: loop exit
PB: predicated region body
PF: predicated region fallthrough
CT: control target
= control target key end

     0   :  { %s834_s0 = inlined_call_operand.hbm [shape: s32[2,2], index: 0, kind: input, shape index: {}]   ;;  %s835_s1 = inlined_call_operand.hbm [shape: f32[2,4,16,16], index: 1, kind: input, shape index: {}]   ;;  %s836_s2 = inlined_call_operand.hbm [shape: f32[2,4,16,16], index: 2, kind: output, shape index: {}]  }
   0x1   :  { %s610_s11 = scalar_lea.hbm %s834_s0, 32 }
   0x2   :  { %p611_p0 = scmp.ne.s32.totalorder %s834_s0, %s610_s11  ;;  %p614_p1 = scmp.lt.u32.totalorder %s610_s11, %s834_s0 }
   0x4   :  { %p616_p2 = pnand %p614_p1, %p611_p0 }
   0x6   :  { %619 = shalt.err (!%p616_p2)  }
   0x7   :  { %s670_s16 = smov [#allocation4]  }
   0x8   :  { %8 = dma.hbm_to_smem %s834_s0, 32, %s670_s16, [#allocation3] }
   0x9   :  { %664 = dma.done.wait [#allocation3], 32 }
   0xa   :  { %665 = vsyncadd [#allocation3], 4294967264 }
   0xb   :  { %10 = sfence }
   0xc   :  { %11 = vsyncpa [#allocation6], 0 }
   0xd   :  { %12 = vsyncpa [#allocation7], 0  ;;  %s671_s19 = smov [#allocation5]   ;;  %s620_s23 = scalar_lea.hbm %s835_s1, 2048 }
   0xe   :  { %s18_s20 = sshll.u32 %s671_s19, 4  ;;  %p621_p3 = scmp.ne.s32.totalorder %s835_s1, %s620_s23  ;;  %s19_s20 = int_to_ptr.vmem [resolvable:$true] %s18_s20 }
   0xf   :  { %p624_p4 = scmp.lt.u32.totalorder %s620_s23, %s835_s1 }
  0x11   :  { %p626_p5 = pnand %p624_p4, %p621_p3 }
  0x13   :  { %629 = shalt.err (!%p626_p5)
}
  0x14   :  { %s630_s0 = scalar_lea.vmem %s19_s20, 2048  ;;  %p635_p7 = scmp.lt.s32.totalorder %s19_s20, %s19_s20 }
  0x15   :  { %p631_p6 = scmp.ne.s32.totalorder %s19_s20, %s630_s0  ;;  %p636_p8 = scmp.lt.s32.totalorder %s630_s0, %s630_s0 }
  0x17   :  { %p637_p9 = por %p636_p8, %p635_p7 }
  0x19   :  { %p638_p10 = pnand %p637_p9, %p631_p6 }
  0x1b   :  { %641 = shalt.err (!%p638_p10)
}
  0x1c   :  { %s672_s28 = smov 128   ;;  %s673_s29 = smov 8  }
  0x1d   :  { %24 = dma.hbm_to_vmem [thread:$0]  %s835_s1, 2048, %s19_s20, [#allocation6], %s672_s28, %s672_s28, %s673_s29  }
  0x1e   :  { %666 = dma.done.wait [#allocation6], 2048  }
  0x1f   :  { %667 = vsyncadd [#allocation6], 4294965248  ;;  %v61_v0 = vlaneseq  ;;  %s148_s4 = sld [smem:[#allocation4]]  ;;  %s521_s5 = sld [smem:[#allocation4 + $0x1]]  ;;  %vm44_vm0 = vcmask 130048   ;;  %vm125_vm1 = vcmask 125952  }
  0x20   :  { %v28_v6 = vld [vmem:[#allocation5] sm:$0xff]  ;;  %v29_v7 = vld [vmem:[#allocation5 + $0x8] sm:$0xff]  ;;  %v30_v8 = vld [vmem:[#allocation5 + $0x10] sm:$0xff]  ;;  %s748_s7 = sld [smem:[#allocation4 + $0x80]]  ;;  %s766_s8 = sld [smem:[#allocation4 + $0x81]] }
  0x21   :  { %v718_v1 = vshrl.u32 %v61_v0, 7  ;;  %v146_v4 = vand.u32 127, %v61_v0  ;;  %v31_v11 = vld [vmem:[#allocation5 + $0x18] sm:$0xff]  ;;  %v32_v12 = vld [vmem:[#allocation5 + $0x20] sm:$0xff]  ;;  %v33_v13 = vld [vmem:[#allocation5 + $0x28] sm:$0xff]  ;;  %45 = vst.msk [vmem:[#allocation2 + $0x4] sm:$0xff] %vm44_vm0, %v28_v6 }
  0x22   :  { %46 = vst.msk [vmem:[#allocation2 + $0xc] sm:$0xff] %vm44_vm0, %v29_v7  ;;  %47 = vst.msk [vmem:[#allocation2 + $0x1c] sm:$0xff] %vm44_vm0, %v30_v8  ;;  %v34_v18 = vld [vmem:[#allocation5 + $0x30] sm:$0xff]  ;;  %v35_v19 = vld [vmem:[#allocation5 + $0x38] sm:$0xff]  ;;  %v674_v46 = vmov 1.0|1.0  }
  0x23   :  { %v721_v2 = vsub.s32 0, %v718_v1  ;;  %v724_v3 = vsub.s32 7, %v718_v1  ;;  %v727_v5 = vadd.s32 8, %v718_v1  ;;  %v36_v20 = vld [vmem:[#allocation5 + $0x40] sm:$0xff]  ;;  %48 = vst.msk [vmem:[#allocation2 + $0x24] sm:$0xff] %vm44_vm0, %v31_v11  ;;  %49 = vst.msk [vmem:[#allocation2 + $0x34] sm:$0xff] %vm44_vm0, %v32_v12 }
  0x24   :  { %50 = vst.msk [vmem:[#allocation2 + $0x3c] sm:$0xff] %vm44_vm0, %v33_v13  ;;  %v37_v23 = vld [vmem:[#allocation5 + $0x48] sm:$0xff]  ;;  %v38_v24 = vld [vmem:[#allocation5 + $0x50] sm:$0xff]  ;;  %v39_v25 = vld [vmem:[#allocation5 + $0x58] sm:$0xff]  ;;  %s675_s11 = smov [#allocation8]  }
  0x25   :  { %s508_s1 = sadd.s32 4294967292, %s148_s4  ;;  %s531_s6 = sadd.s32 4294967292, %s521_s5  ;;  %v64_v14 = vrot.slane %v28_v6, %v721_v2  ;;  %v68_v15 = vrot.slane %v30_v8, %v721_v2  ;;  %v72_v21 = vrot.slane %v32_v12, %v721_v2  ;;  %v96_v22 = vrot.slane %v29_v7, %v724_v3  ;;  %51 = vst.msk [vmem:[#allocation2 + $0x4c] sm:$0xff] %vm44_vm0, %v34_v18  ;;  %v40_v30 = vld [vmem:[#allocation5 + $0x60] sm:$0xff]  ;;  %v41_v31 = vld [vmem:[#allocation5 + $0x68] sm:$0xff]  ;;  %v42_v32 = vld [vmem:[#allocation5 + $0x70] sm:$0xff] }
  0x26   :  { %v167_v9 = vstv %s508_s1  ;;  %v337_v10 = vstv %s531_s6  ;;  %52 = vst.msk [vmem:[#allocation2 + $0x54] sm:$0xff] %vm44_vm0, %v35_v19  ;;  %53 = vst.msk [vmem:[#allocation2 + $0x64] sm:$0xff] %vm44_vm0, %v36_v20  ;;  %v76_v26 = vrot.slane %v34_v18, %v721_v2  ;;  %v80_v27 = vrot.slane %v36_v20, %v721_v2  ;;  %v43_v37 = vld [vmem:[#allocation5 + $0x78] sm:$0xff]  ;;  %s157_s9 = scalar_lea.vmem [#allocation2], %s748_s7  ;;  %s505_s10 = scalar_lea.vmem [#allocation2], %s766_s8 }
  0x27   :  { %v168_v16 = vadd.s32 %v167_v9, %v146_v4  ;;  %v338_v17 = vadd.s32 %v337_v10, %v146_v4  ;;  %v100_v28 = vrot.slane %v31_v11, %v724_v3  ;;  %v104_v29 = vrot.slane %v33_v13, %v724_v3  ;;  %126 = vst.msk [vmem:[#allocation2] sm:$0xf] %vm125_vm1, %v64_v14  ;;  %s492_s12 = sshll.u32 %s675_s11, 4  ;;  %s493_s12 = int_to_ptr.vmem [resolvable:$true] %s492_s12 }
  0x28   :  { %127 = vst.msk [vmem:[#allocation2 + $0x18] sm:$0xf] %vm125_vm1, %v68_v15  ;;  %v84_v33 = vrot.slane %v38_v24, %v721_v2  ;;  %v108_v34 = vrot.slane %v35_v19, %v724_v3  ;;  %128 = vst.msk [vmem:[#allocation2 + $0x30] sm:$0xf] %vm125_vm1, %v72_v21  ;;  %v88_v38 = vrot.slane %v40_v30, %v721_v2  ;;  %s642_s13 = scalar_lea.vmem %s493_s12, 2048  ;;  %p647_p12 = scmp.lt.s32.totalorder %s493_s12, %s493_s12 }
  0x29   :  { %vm169_vm2 = vcmp.gt.s32.totalorder %v168_v16, 0  ;;  %vm339_vm3 = vcmp.gt.s32.totalorder %v338_v17, 0  ;;  %54 = vst.msk [vmem:[#allocation2 + $0x6c] sm:$0xff] %vm44_vm0, %v37_v23  ;;  %55 = vst.msk [vmem:[#allocation2 + $0x7c] sm:$0xff] %vm44_vm0, %v38_v24  ;;  %v92_v39 = vrot.slane %v42_v32, %v721_v2  ;;  %v112_v40 = vrot.slane %v37_v23, %v724_v3  ;;  %p643_p11 = scmp.ne.s32.totalorder %s493_s12, %s642_s13  ;;  %p648_p13 = scmp.lt.s32.totalorder %s642_s13, %s642_s13 }
  0x2a   :  { %56 = vst.msk [vmem:[#allocation2 + $0x84] sm:$0xff] %vm44_vm0, %v39_v25  ;;  %v170_v35 = vsel %vm169_vm2, %v168_v16, 0  ;;  %v340_v36 = vsel %vm339_vm3, %v338_v17, 0  ;;  %57 = vst.msk [vmem:[#allocation2 + $0x94] sm:$0xff] %vm44_vm0, %v40_v30  ;;  %v116_v41 = vrot.slane %v39_v25, %v724_v3  ;;  %v120_v44 = vrot.slane %v41_v31, %v724_v3 }
  0x2b   :  { %134 = vst.msk [vmem:[#allocation2 + $0x14] sm:$0xf] %vm125_vm1, %v96_v22  ;;  %129 = vst.msk [vmem:[#allocation2 + $0x48] sm:$0xf] %vm125_vm1, %v76_v26  ;;  %vm171_vm4 = vcmp.lt.s32.totalorder %v170_v35, 15  ;;  %vm341_vm5 = vcmp.lt.s32.totalorder %v340_v36, 15  ;;  %v124_v45 = vrot.slane %v43_v37, %v724_v3  ;;  %p649_p0 = por %p648_p13, %p647_p12 }
  0x2c   :  { %58 = vst.msk [vmem:[#allocation2 + $0x9c] sm:$0xff] %vm44_vm0, %v41_v31  ;;  %59 = vst.msk [vmem:[#allocation2 + $0xac] sm:$0xff] %vm44_vm0, %v42_v32  ;;  %v172_v42 = vsel %vm171_vm4, %v170_v35, 15  ;;  %v342_v43 = vsel %vm341_vm5, %v340_v36, 15 }
  0x2d   :  { %130 = vst.msk [vmem:[#allocation2 + $0x60] sm:$0xf] %vm125_vm1, %v80_v27  ;;  %135 = vst.msk [vmem:[#allocation2 + $0x2c] sm:$0xf] %vm125_vm1, %v100_v28  ;;  %vm173_vm6 = vcmp.eq.s32.totalorder %v718_v1, %v172_v42  ;;  %vm174_vm7 = vcmp.eq.s32.totalorder %v727_v5, %v172_v42  ;;  %vm343_vm8 = vcmp.eq.s32.totalorder %v718_v1, %v342_v43  ;;  %p650_p1 = pnand %p649_p0, %p643_p11 }
  0x2e   :  { %136 = vst.msk [vmem:[#allocation2 + $0x44] sm:$0xf] %vm125_vm1, %v104_v29  ;;  %131 = vst.msk [vmem:[#allocation2 + $0x78] sm:$0xf] %vm125_vm1, %v84_v33  ;;  %vm344_vm9 = vcmp.eq.s32.totalorder %v727_v5, %v342_v43 }
  0x2f   :  { %60 = vst.msk [vmem:[#allocation2 + $0xb4] sm:$0xff] %vm44_vm0, %v43_v37  ;;  %vm596_vm10 = vmpackc.low %vm174_vm7, %vm173_vm6 }
  0x30   :  { %137 = vst.msk [vmem:[#allocation2 + $0x5c] sm:$0xf] %vm125_vm1, %v108_v34  ;;  %132 = vst.msk [vmem:[#allocation2 + $0x90] sm:$0xf] %vm125_vm1, %v88_v38  ;;  %597 = vmatprep.subr.msk.bf16.mxu0 %vm596_vm10, %v674_v46 }
  0x31   :  { %133 = vst.msk [vmem:[#allocation2 + $0xa8] sm:$0xf] %vm125_vm1, %v92_v39  ;;  %138 = vst.msk [vmem:[#allocation2 + $0x74] sm:$0xf] %vm125_vm1, %v112_v40  ;;  %599 = vmatpush3.bf16.msk.msra.mxu0 %vm596_vm10, %v674_v46 }
  0x32   :  { %139 = vst.msk [vmem:[#allocation2 + $0x8c] sm:$0xf] %vm125_vm1, %v116_v41  ;;  %140 = vst.msk [vmem:[#allocation2 + $0xa4] sm:$0xf] %vm125_vm1, %v120_v44 }
  0x33   :  { %141 = vst.msk [vmem:[#allocation2 + $0xbc] sm:$0xf] %vm125_vm1, %v124_v45  ;;  %vm600_vm11 = vmpackc.low %vm344_vm9, %vm343_vm8 }
  0x34   :  { %601 = vmatprep.subr.msk.bf16.mxu1 %vm600_vm11, %v674_v46 }
  0x35   :  { %603 = vmatpush3.bf16.msk.msra.mxu1 %vm600_vm11, %v674_v46 }
  0x3a   :  { %v158_v47 = vld [vmem:[%s157_s9] sm:$0xff]  ;;  %v159_v49 = vld [vmem:[%s157_s9 + $0x8] sm:$0xff]  ;;  %v160_v51 = vld [vmem:[%s157_s9 + $0x18] sm:$0xff] }
  0x3b   :  { %v523_v48 = vld [vmem:[%s505_s10 + $0x60] sm:$0xff]  ;;  %568 = vmatprep.mubr.msk.f32.mxu0 %vm44_vm0, %v158_v47  ;;  %v524_v50 = vld [vmem:[%s505_s10 + $0x68] sm:$0xff]  ;;  %v525_v52 = vld [vmem:[%s505_s10 + $0x78] sm:$0xff] }
  0x3c   :  { %584 = vmatprep.mubr.msk.f32.mxu1 %vm44_vm0, %v523_v48  ;;  %569 = vmatmul.mubr.msk.f32.vlgmr.msra.gmra.mrb[0].mxu0 %vm44_vm0, %v159_v49  ;;  %v161_v53 = vld [vmem:[%s157_s9 + $0x20] sm:$0xff]  ;;  %v162_v55 = vld [vmem:[%s157_s9 + $0x30] sm:$0xff]  ;;  %v163_v57 = vld [vmem:[%s157_s9 + $0x38] sm:$0xff] }
  0x3d   :  { %585 = vmatmul.mubr.msk.f32.vlgmr.msra.gmra.mrb[0].mxu1 %vm44_vm0, %v524_v50  ;;  %571 = vmatprep.mubr.msk.f32.mxu0 %vm44_vm0, %v160_v51  ;;  %v526_v54 = vld [vmem:[%s505_s10 + $0x80] sm:$0xff]  ;;  %v527_v56 = vld [vmem:[%s505_s10 + $0x90] sm:$0xff]  ;;  %v528_v58 = vld [vmem:[%s505_s10 + $0x98] sm:$0xff] }
  0x3e   :  { %587 = vmatprep.mubr.msk.f32.mxu1 %vm44_vm0, %v525_v52  ;;  %v164_v59 = vld [vmem:[%s157_s9 + $0x48] sm:$0xff]  ;;  %v165_v61 = vld [vmem:[%s157_s9 + $0x50] sm:$0xff] }
  0x3f   :  { %v529_v60 = vld [vmem:[%s505_s10 + $0xa8] sm:$0xff]  ;;  %v530_v62 = vld [vmem:[%s505_s10 + $0xb0] sm:$0xff] }
  0x40   :  { %572 = vmatmul.mubr.msk.f32.gmra.mrb[2].mxu0 %vm44_vm0, %v161_v53 }
  0x41   :  { %588 = vmatmul.mubr.msk.f32.gmra.mrb[2].mxu1 %vm44_vm0, %v526_v54  ;;  %574 = vmatprep.mubr.msk.f32.mxu0 %vm44_vm0, %v162_v55 }
  0x42   :  { %590 = vmatprep.mubr.msk.f32.mxu1 %vm44_vm0, %v527_v56 }
  0x44   :  { %575 = vmatmul.mubr.msk.f32.gmra.mrb[4].mxu0 %vm44_vm0, %v163_v57 }
  0x45   :  { %591 = vmatmul.mubr.msk.f32.gmra.mrb[4].mxu1 %vm44_vm0, %v528_v58  ;;  %577 = vmatprep.mubr.msk.f32.mxu0 %vm44_vm0, %v164_v59 }
  0x46   :  { %593 = vmatprep.mubr.msk.f32.mxu1 %vm44_vm0, %v529_v60 }
  0x48   :  { %578 = vmatmul.mubr.msk.f32.gmra.mrb[6].mxu0 %vm44_vm0, %v165_v61 }
  0x49   :  { %594 = vmatmul.mubr.msk.f32.gmra.mrb[6].mxu1 %vm44_vm0, %v530_v62 }
 0x10f   :  { %v570_v63 = vpop.f32.mrb[0].mxu0 }
 0x110   :  { %v586_v0 = vpop.f32.mrb[0].mxu1  ;;  %309 = vst.msk [vmem:[#allocation8 + $0x8] sm:$0xff] %vm44_vm0, %v570_v63  ;;  %v269_v1 = vpop.f32.mrb[1].mxu0 }
 0x111   :  { %480 = vst.msk [vmem:[#allocation8 + $0x48] sm:$0xff] %vm44_vm0, %v586_v0  ;;  %v439_v2 = vpop.f32.mrb[1].mxu1  ;;  %308 = vst.msk [vmem:[#allocation8] sm:$0xff] %vm44_vm0, %v269_v1 }
 0x112   :  { %479 = vst.msk [vmem:[#allocation8 + $0x40] sm:$0xff] %vm44_vm0, %v439_v2 }
 0x113   :  { %v573_v3 = vpop.f32.mrb[2].mxu0 }
 0x114   :  { %v589_v4 = vpop.f32.mrb[2].mxu1  ;;  %311 = vst.msk [vmem:[#allocation8 + $0x18] sm:$0xff] %vm44_vm0, %v573_v3  ;;  %v279_v5 = vpop.f32.mrb[3].mxu0 }
 0x115   :  { %482 = vst.msk [vmem:[#allocation8 + $0x58] sm:$0xff] %vm44_vm0, %v589_v4  ;;  %v449_v6 = vpop.f32.mrb[3].mxu1  ;;  %310 = vst.msk [vmem:[#allocation8 + $0x10] sm:$0xff] %vm44_vm0, %v279_v5 }
 0x116   :  { %481 = vst.msk [vmem:[#allocation8 + $0x50] sm:$0xff] %vm44_vm0, %v449_v6 }
 0x117   :  { %v576_v7 = vpop.f32.mrb[4].mxu0 }
 0x118   :  { %v592_v8 = vpop.f32.mrb[4].mxu1  ;;  %313 = vst.msk [vmem:[#allocation8 + $0x28] sm:$0xff] %vm44_vm0, %v576_v7  ;;  %v289_v9 = vpop.f32.mrb[5].mxu0 }
 0x119   :  { %484 = vst.msk [vmem:[#allocation8 + $0x68] sm:$0xff] %vm44_vm0, %v592_v8  ;;  %v459_v10 = vpop.f32.mrb[5].mxu1  ;;  %312 = vst.msk [vmem:[#allocation8 + $0x20] sm:$0xff] %vm44_vm0, %v289_v9 }
 0x11a   :  { %483 = vst.msk [vmem:[#allocation8 + $0x60] sm:$0xff] %vm44_vm0, %v459_v10 }
 0x11b   :  { %v579_v11 = vpop.f32.mrb[6].mxu0 }
 0x11c   :  { %v595_v12 = vpop.f32.mrb[6].mxu1  ;;  %315 = vst.msk [vmem:[#allocation8 + $0x38] sm:$0xff] %vm44_vm0, %v579_v11  ;;  %v299_v13 = vpop.f32.mrb[7].mxu0 }
 0x11d   :  { %486 = vst.msk [vmem:[#allocation8 + $0x78] sm:$0xff] %vm44_vm0, %v595_v12  ;;  %v469_v14 = vpop.f32.mrb[7].mxu1  ;;  %314 = vst.msk [vmem:[#allocation8 + $0x30] sm:$0xff] %vm44_vm0, %v299_v13 }
 0x11e   :  { %485 = vst.msk [vmem:[#allocation8 + $0x70] sm:$0xff] %vm44_vm0, %v469_v14 }
 0x11f   :  { %653 = shalt.err (!%p650_p1)
}
 0x120   :  { %s654_s16 = scalar_lea.hbm %s836_s2, 2048 }
 0x121   :  { %p655_p2 = scmp.ne.s32.totalorder %s836_s2, %s654_s16  ;;  %p658_p3 = scmp.lt.u32.totalorder %s654_s16, %s836_s2 }
 0x123   :  { %p660_p4 = pnand %p658_p3, %p655_p2 }
 0x125   :  { %663 = shalt.err (!%p660_p4)
}
 0x126   :  { %498 = dma.vmem_to_hbm [thread:$0]  %s493_s12, 2048, %s836_s2, [#allocation7], %s672_s28, %s672_s28, %s673_s29  }
 0x127   :  { %668 = dma.done.wait [#allocation7], 2048  }
 0x128   :  { %669 = vsyncadd [#allocation7], 4294965248 }
 0x129   :  { %502 = vsyncpa [#allocation6], 1 }
 0x12a   :  { %503 = vsyncpa [#allocation7], 1 }

</bundles_post_ra>
